<compile_context>
chip_gen: v7x
topology: tpu7x:2x2x1
jax: 0.10.0
libtpu: 0.0.40
codegen_flags: <defaults>
</compile_context>

<pallas_src>
import jax
import jax.numpy as jnp
from jax.experimental import pallas as pl
from jax.experimental.pallas import tpu as pltpu


def policy_kernel(eps_ref,                       # SMEM (1,) f32: effective epsilon
                  s_ref, w1_ref, b1_ref, w2_ref, b2_ref, w3_ref, b3_ref,
                  rnd_ref,                       # VMEM (B, 2) f32 uniforms
                  aw_ref, act_ref, avec_ref):
    B, a_dim = aw_ref.shape

    # ---- MLP forward: f32 operands, f32 accumulate ----
    h1 = jnp.dot(s_ref[...], w1_ref[...], preferred_element_type=jnp.float32)
    h1 = jnp.maximum(h1 + b1_ref[...], 0.0)
    h2 = jnp.dot(h1, w2_ref[...], preferred_element_type=jnp.float32)
    h2 = jnp.maximum(h2 + b2_ref[...], 0.0)
    aw = jnp.dot(h2, w3_ref[...], preferred_element_type=jnp.float32)
    aw = aw + b3_ref[...]
    aw_ref[...] = aw

    # ---- Greedy action: lowest index achieving the per-row max (argmax) ----
    col_ids = jax.lax.broadcasted_iota(jnp.int32, (B, a_dim), 1)
    row_max = jnp.max(aw, axis=-1, keepdims=True)
    greedy = jnp.min(jnp.where(aw == row_max, col_ids, a_dim),
                     axis=-1, keepdims=True)                       # (B, 1) int32

    # ---- Fused epsilon-greedy exploration ----
    u_explore = rnd_ref[:, 0:1]                                    # (B, 1) in [0, 1)
    u_action = rnd_ref[:, 1:2]                                     # (B, 1) in [0, 1)
    rand_a = jnp.minimum(jnp.floor(u_action * a_dim).astype(jnp.int32),
                         a_dim - 1)                                # (B, 1) in [0, a_dim)

    eff_eps = eps_ref[0]   # -1.0 in eval mode => never explore
    action = jnp.where(u_explore < eff_eps, rand_a, greedy)

    act_ref[...] = action
    avec_ref[...] = (col_ids == action).astype(jnp.float32)        # one-hot a_vec


def _policy_call(s, params, eff_eps, rnd):
    """One fused launch: (a_weights [B,a_dim] f32, action [B,1] i32, one_hot [B,a_dim] f32)."""
    w1, b1, w2, b2, w3, b3 = params
    B, s_dim = s.shape
    h_dim = w1.shape[1]
    a_dim = w3.shape[1]

    eps_arr = jnp.asarray(eff_eps, jnp.float32).reshape((1,))

    flops = 2 * B * (s_dim * h_dim + h_dim * h_dim + h_dim * a_dim)
    bytes_accessed = 4 * (
        s.size + w1.size + b1.size + w2.size + b2.size + w3.size + b3.size
        + rnd.size + 1
        + B * a_dim * 2 + B                    # outputs
    )

    smem = pl.BlockSpec(memory_space=pltpu.MemorySpace.SMEM)
    vmem = pl.BlockSpec(memory_space=pltpu.MemorySpace.VMEM)

    aw, act, avec = pl.pallas_call(
        policy_kernel,
        out_shape=(
            jax.ShapeDtypeStruct((B, a_dim), jnp.float32),
            jax.ShapeDtypeStruct((B, 1), jnp.int32),
            jax.ShapeDtypeStruct((B, a_dim), jnp.float32),
        ),
        in_specs=[smem] + [vmem] * 8,
        out_specs=(vmem, vmem, vmem),
        cost_estimate=pl.CostEstimate(
            flops=flops, transcendentals=0, bytes_accessed=bytes_accessed),
    )(eps_arr, s, w1, b1, w2, b2, w3, b3, rnd)
    return aw, act, avec


def epsilon_greedy_forward(s, params):
    """Equivalent of EpsilonGreedyPolicy.forward: s [B, s_dim] -> a_weights [B, a_dim]."""
    B = s.shape[0]
    rnd = jnp.zeros((B, 2), jnp.float32)
    aw, _, _ = _policy_call(s, params, jnp.float32(-1.0), rnd)
    return aw


def epsilon_greedy_select_action(s, params, key, epsilon, is_train=True):
    """Fused select_action.

    epsilon / is_train / key may be traced values (no retrace per step).
    Returns (a_weights [B,a_dim], action [B,1] int32, one-hot a_vec [B,a_dim]).
    """
    B = s.shape[0]
    rnd = jax.random.uniform(key, (B, 2), jnp.float32)
    # eval mode => effective epsilon below any uniform draw => never explore.
    eff_eps = jnp.where(jnp.asarray(is_train),
                        jnp.asarray(epsilon, jnp.float32),
                        jnp.float32(-1.0))
    return _policy_call(s, params, eff_eps, rnd)


def update_epsilon(epoch, start=0.1, end=0.0, end_epoch=200):
    """Host-side epsilon schedule (pure Python, mirrors the PyTorch module)."""
    a = -(float(start) - float(end)) / float(end_epoch)
    return max(float(end), a * float(epoch) + float(start))


def init_params(key, s_dim, h_dim, a_dim):
    """nn.Linear-style uniform(-1/sqrt(fan_in), 1/sqrt(fan_in)) init.

    Weights stored as [in_features, out_features] (transposed vs PyTorch);
    biases stored as [1, out_features] (broadcast happens inside the kernel).
    """
    ks = jax.random.split(key, 6)

    def lin(kw, kb, fan_in, fan_out):
        bound = 1.0 / jnp.sqrt(jnp.float32(fan_in))
        w = jax.random.uniform(kw, (fan_in, fan_out), jnp.float32, -bound, bound)
        b = jax.random.uniform(kb, (1, fan_out), jnp.float32, -bound, bound)
        return w, b

    w1, b1 = lin(ks[0], ks[1], s_dim, h_dim)
    w2, b2 = lin(ks[2], ks[3], h_dim, h_dim)
    w3, b3 = lin(ks[4], ks[5], h_dim, a_dim)
    return (w1, b1, w2, b2, w3, b3)


def ref_forward(s, params):
    """Pure-JAX f32 reference of the MLP."""
    w1, b1, w2, b2, w3, b3 = params
    h1 = jnp.maximum(jnp.dot(s, w1, preferred_element_type=jnp.float32) + b1, 0.0)
    h2 = jnp.maximum(jnp.dot(h1, w2, preferred_element_type=jnp.float32) + b2, 0.0)
    return jnp.dot(h2, w3, preferred_element_type=jnp.float32) + b3


if __name__ == "__main__":
    s_dim, h_dim, a_dim = 16, 32, 8
    batch = 8   # demo size; in the RL loop stack environments so B grows

    key = jax.random.PRNGKey(0)
    k_params, k_input, k_act1, k_act2 = jax.random.split(key, 4)

    params = init_params(k_params, s_dim, h_dim, a_dim)
    s = jax.random.normal(k_input, (batch, s_dim), jnp.float32)

    # --- Greedy (eval) path: deterministic, check against f32 reference ---
    a_weights, action, a_vec = epsilon_greedy_select_action(
        s, params, k_act1, epsilon=0.1, is_train=False)
    jax.block_until_ready(a_weights)

    ref_aw = ref_forward(s, params)
    assert a_weights.shape == (batch, a_dim)
    assert jnp.allclose(a_weights, ref_aw, atol=2e-3, rtol=2e-3)

    # Greedy action must be the argmax of the kernel's own a_weights (exact).
    greedy_ref = jnp.argmax(a_weights, axis=-1).astype(jnp.int32)
    assert jnp.array_equal(action[:, 0], greedy_ref)
    assert jnp.allclose(a_vec, jax.nn.one_hot(greedy_ref, a_dim))

    # forward() wrapper matches the module's forward semantics.
    fwd = epsilon_greedy_forward(s, params)
    jax.block_until_ready(fwd)
    assert jnp.allclose(fwd, ref_aw, atol=2e-3, rtol=2e-3)

    # --- Exploration (train) path: actions valid, one-hot consistent ---
    eps_now = update_epsilon(epoch=10)  # host-side schedule
    aw2, act2, vec2 = epsilon_greedy_select_action(
        s, params, k_act2, epsilon=max(eps_now, 0.5), is_train=True)
    jax.block_until_ready(act2)
    assert jnp.all((act2 >= 0) & (act2 < a_dim))
    assert jnp.allclose(vec2.sum(axis=-1), 1.0)
    assert jnp.all(jnp.take_along_axis(vec2, act2, axis=-1) == 1.0)

    print("KERNEL_OK")
</pallas_src>

<mosaic_0001>
module attributes {stable_mosaic.version = 11 : i64} {
  func.func @policy_kernel(%arg0: memref<1xf32, #tpu.memory_space<smem>>, %arg1: memref<8x16xf32, #tpu.memory_space<vmem>>, %arg2: memref<16x32xf32, #tpu.memory_space<vmem>>, %arg3: memref<1x32xf32, #tpu.memory_space<vmem>>, %arg4: memref<32x32xf32, #tpu.memory_space<vmem>>, %arg5: memref<1x32xf32, #tpu.memory_space<vmem>>, %arg6: memref<32x8xf32, #tpu.memory_space<vmem>>, %arg7: memref<1x8xf32, #tpu.memory_space<vmem>>, %arg8: memref<8x2xf32, #tpu.memory_space<vmem>>, %arg9: memref<8x8xf32, #tpu.memory_space<vmem>>, %arg10: memref<8x1xi32, #tpu.memory_space<vmem>>, %arg11: memref<8x8xf32, #tpu.memory_space<vmem>>) attributes {dimension_semantics = [], scalar_prefetch = 0 : i64, scratch_operands = 0 : i64, tpu.core_type = #tpu.core_type<tc>} {
    %c0 = arith.constant 0 : index
    %c0_0 = arith.constant 0 : index
    %0 = vector.load %arg1[%c0, %c0_0] : memref<8x16xf32, #tpu.memory_space<vmem>>, vector<8x16xf32>
    %c0_1 = arith.constant 0 : index
    %c0_2 = arith.constant 0 : index
    %1 = vector.load %arg2[%c0_1, %c0_2] : memref<16x32xf32, #tpu.memory_space<vmem>>, vector<16x32xf32>
    %cst = arith.constant dense<0.000000e+00> : vector<8x32xf32>
    %2 = tpu.matmul %0, %1, %cst {dimension_numbers = #tpu.dot_dimension_numbers<[1], [0], [0], [1], [0, 0, 1, 1], [], []>} : vector<8x16xf32>, vector<16x32xf32>, vector<8x32xf32> -> vector<8x32xf32>
    %c0_3 = arith.constant 0 : index
    %c0_4 = arith.constant 0 : index
    %3 = vector.load %arg3[%c0_3, %c0_4] : memref<1x32xf32, #tpu.memory_space<vmem>>, vector<1x32xf32>
    %4 = vector.broadcast %3 : vector<1x32xf32> to vector<8x32xf32>
    %5 = arith.addf %2, %4 : vector<8x32xf32>
    %cst_5 = arith.constant 0.000000e+00 : f32
    %6 = vector.broadcast %cst_5 : f32 to vector<8x32xf32>
    %7 = arith.maximumf %5, %6 : vector<8x32xf32>
    %c0_6 = arith.constant 0 : index
    %c0_7 = arith.constant 0 : index
    %8 = vector.load %arg4[%c0_6, %c0_7] : memref<32x32xf32, #tpu.memory_space<vmem>>, vector<32x32xf32>
    %cst_8 = arith.constant dense<0.000000e+00> : vector<8x32xf32>
    %9 = tpu.matmul %7, %8, %cst_8 {dimension_numbers = #tpu.dot_dimension_numbers<[1], [0], [0], [1], [0, 0, 1, 1], [], []>} : vector<8x32xf32>, vector<32x32xf32>, vector<8x32xf32> -> vector<8x32xf32>
    %c0_9 = arith.constant 0 : index
    %c0_10 = arith.constant 0 : index
    %10 = vector.load %arg5[%c0_9, %c0_10] : memref<1x32xf32, #tpu.memory_space<vmem>>, vector<1x32xf32>
    %11 = vector.broadcast %10 : vector<1x32xf32> to vector<8x32xf32>
    %12 = arith.addf %9, %11 : vector<8x32xf32>
    %cst_11 = arith.constant 0.000000e+00 : f32
    %13 = vector.broadcast %cst_11 : f32 to vector<8x32xf32>
    %14 = arith.maximumf %12, %13 : vector<8x32xf32>
    %c0_12 = arith.constant 0 : index
    %c0_13 = arith.constant 0 : index
    %15 = vector.load %arg6[%c0_12, %c0_13] : memref<32x8xf32, #tpu.memory_space<vmem>>, vector<32x8xf32>
    %cst_14 = arith.constant dense<0.000000e+00> : vector<8x8xf32>
    %16 = tpu.matmul %14, %15, %cst_14 {dimension_numbers = #tpu.dot_dimension_numbers<[1], [0], [0], [1], [0, 0, 1, 1], [], []>} : vector<8x32xf32>, vector<32x8xf32>, vector<8x8xf32> -> vector<8x8xf32>
    %c0_15 = arith.constant 0 : index
    %c0_16 = arith.constant 0 : index
    %17 = vector.load %arg7[%c0_15, %c0_16] : memref<1x8xf32, #tpu.memory_space<vmem>>, vector<1x8xf32>
    %18 = vector.broadcast %17 : vector<1x8xf32> to vector<8x8xf32>
    %19 = arith.addf %16, %18 : vector<8x8xf32>
    %c0_17 = arith.constant 0 : index
    %c0_18 = arith.constant 0 : index
    %20 = vector.load %arg9[%c0_17, %c0_18] : memref<8x8xf32, #tpu.memory_space<vmem>>, vector<8x8xf32>
    tpu.vector_store %arg9[%c0_17, %c0_18], %19 {strides = array<i32>} : memref<8x8xf32, #tpu.memory_space<vmem>>, vector<8x8xf32>,
    %21 = tpu.iota {dimensions = array<i32: 1>} : vector<8x8xi32>
    %cst_19 = arith.constant dense<0xFF800000> : vector<8xf32>
    %22 = vector.multi_reduction <maximumf>, %19, %cst_19 [1] : vector<8x8xf32> to vector<8xf32>
    %23 = vector.shape_cast %22 : vector<8xf32> to vector<8x1xf32>
    %24 = vector.broadcast %23 : vector<8x1xf32> to vector<8x8xf32>
    %25 = arith.cmpf oeq, %19, %24 : vector<8x8xf32>
    %c8_i32 = arith.constant 8 : i32
    %26 = vector.broadcast %c8_i32 : i32 to vector<8x8xi32>
    %27 = arith.select %25, %21, %26 : vector<8x8xi1>, vector<8x8xi32>
    %cst_20 = arith.constant dense<2147483647> : vector<8xi32>
    %28 = vector.multi_reduction <minsi>, %27, %cst_20 [1] : vector<8x8xi32> to vector<8xi32>
    %29 = vector.shape_cast %28 : vector<8xi32> to vector<8x1xi32>
    %c0_21 = arith.constant 0 : index
    %c0_22 = arith.constant 0 : index
    %30 = vector.load %arg8[%c0_21, %c0_22] : memref<8x2xf32, #tpu.memory_space<vmem>>, vector<8x1xf32>
    %c0_23 = arith.constant 0 : index
    %c1 = arith.constant 1 : index
    %31 = vector.load %arg8[%c0_23, %c1] : memref<8x2xf32, #tpu.memory_space<vmem>>, vector<8x1xf32>
    %cst_24 = arith.constant 8.000000e+00 : f32
    %32 = vector.broadcast %cst_24 : f32 to vector<8x1xf32>
    %33 = arith.mulf %31, %32 : vector<8x1xf32>
    %34 = math.floor %33 : vector<8x1xf32>
    %35 = arith.fptosi %34 : vector<8x1xf32> to vector<8x1xi32>
    %c7_i32 = arith.constant 7 : i32
    %36 = vector.broadcast %c7_i32 : i32 to vector<8x1xi32>
    %37 = arith.minsi %35, %36 : vector<8x1xi32>
    %c0_25 = arith.constant 0 : index
    %38 = memref.load %arg0[%c0_25] : memref<1xf32, #tpu.memory_space<smem>>
    %39 = vector.broadcast %38 : f32 to vector<8x1xf32>
    %40 = arith.cmpf olt, %30, %39 : vector<8x1xf32>
    %41 = arith.select %40, %37, %29 : vector<8x1xi1>, vector<8x1xi32>
    %c0_26 = arith.constant 0 : index
    %c0_27 = arith.constant 0 : index
    %42 = vector.load %arg10[%c0_26, %c0_27] : memref<8x1xi32, #tpu.memory_space<vmem>>, vector<8x1xi32>
    tpu.vector_store %arg10[%c0_26, %c0_27], %41 {strides = array<i32>} : memref<8x1xi32, #tpu.memory_space<vmem>>, vector<8x1xi32>,
    %43 = vector.broadcast %41 : vector<8x1xi32> to vector<8x8xi32>
    %44 = arith.cmpi eq, %21, %43 : vector<8x8xi32>
    %45 = arith.extui %44 : vector<8x8xi1> to vector<8x8xi32>
    %46 = arith.sitofp %45 : vector<8x8xi32> to vector<8x8xf32>
    %c0_28 = arith.constant 0 : index
    %c0_29 = arith.constant 0 : index
    %47 = vector.load %arg11[%c0_28, %c0_29] : memref<8x8xf32, #tpu.memory_space<vmem>>, vector<8x8xf32>
    tpu.vector_store %arg11[%c0_28, %c0_29], %46 {strides = array<i32>} : memref<8x8xf32, #tpu.memory_space<vmem>>, vector<8x8xf32>,
    return
  }
}

</mosaic_0001>

<bundles_post_ra>
// kernel: tpu_custom_call.1
= control target key start
LH: loop header
LB: loop body
LE: loop exit
PB: predicated region body
PF: predicated region fallthrough
CT: control target
= control target key end

     0   :  { %18 = vsyncpa [#allocation4], 0  ;;  %v492_v2 = vmov 0.0|0.0   ;;  %vm493_vm0 = vmmov 0   ;;  %v494_v4 = vmov 0.0   ;;  %s645_s0 = inlined_call_operand.<no memory space> [shape: f32[1], index: 0, kind: input, shape index: {}]   ;;  %s646_s1 = inlined_call_operand.vmem [shape: f32[8,16], index: 1, kind: input, shape index: {}]   ;;  %s647_s2 = inlined_call_operand.vmem [shape: f32[16,32], index: 2, kind: input, shape index: {}]   ;;  %s648_s3 = inlined_call_operand.vmem [shape: f32[1,32], index: 3, kind: input, shape index: {}]   ;;  %s649_s4 = inlined_call_operand.vmem [shape: f32[32,32], index: 4, kind: input, shape index: {}]   ;;  %s650_s5 = inlined_call_operand.vmem [shape: f32[1,32], index: 5, kind: input, shape index: {}]   ;;  %s651_s6 = inlined_call_operand.vmem [shape: f32[32,8], index: 6, kind: input, shape index: {}]   ;;  %s652_s7 = inlined_call_operand.vmem [shape: f32[1,8], index: 7, kind: input, shape index: {}]   ;;  %s653_s8 = inlined_call_operand.vmem [shape: f32[8,2], index: 8, kind: input, shape index: {}]   ;;  %s654_s9 = inlined_call_operand.hbm [shape: f32[8,8], index: 9, kind: output, shape index: {0}]   ;;  %s655_s10 = inlined_call_operand.vmem [shape: s32[8,1], index: 10, kind: output, shape index: {1}]   ;;  %s656_s11 = inlined_call_operand.hbm [shape: f32[8,8], index: 11, kind: output, shape index: {2}]  }
   0x1   :  { %v39_v0 = vld [vmem:[%s647_s2] sm:$0xff]  ;;  %v40_v1 = vld [vmem:[%s647_s2 + $0x8] sm:$0xff]  ;;  %419 = vmatprep.subr.bf16.mxu0 %v492_v2  ;;  %394 = vmatprep.mubr.msk.f32.mxu0 %vm493_vm0, %v494_v4 }
   0x2   :  { %v420_v3 = vpack.c.bf16 %v40_v1, %v39_v0  ;;  %v123_v5 = vld [vmem:[%s649_s4] sm:$0xff]  ;;  %v124_v6 = vld [vmem:[%s649_s4 + $0x8] sm:$0xff]  ;;  %422 = vmatprep.subr.bf16.mxu1 %v492_v2  ;;  %405 = vmatprep.mubr.msk.f32.mxu1 %vm493_vm0, %v494_v4 }
   0x3   :  { %v423_v7 = vpack.c.bf16 %v124_v6, %v123_v5 }
   0x4   :  { %19 = vsyncpa [#allocation6], 0  ;;  %421 = vmatpush3.bf16.msra.mxu0 %v420_v3  ;;  %v38_v8 = vld [vmem:[%s646_s1] sm:$0xff]  ;;  %vm48_vm1 = vcmask 130048   ;;  %v125_v9 = vld [vmem:[%s649_s4 + $0x10] sm:$0xff]  ;;  %vm134_vm2 = vcmask 261120   ;;  %v295_v33 = vlaneseq  ;;  %v324_v52 = vstv %s645_s0 }
   0x5   :  { %424 = vmatpush3.bf16.msra.mxu1 %v423_v7  ;;  %428 = vmatprep.subr.bf16.mxu0 %v492_v2  ;;  %v126_v10 = vld [vmem:[%s649_s4 + $0x18] sm:$0xff]  ;;  %v209_v12 = vld [vmem:[%s651_s6] sm:$0xff]  ;;  %v210_v13 = vld [vmem:[%s651_s6 + $0x8] sm:$0xff]  ;;  %vm293_vm3 = vcmask 64512   ;;  %v496_v50 = vmov 0   ;;  %vm329_vm8 = vcmask 7168  }
   0x6   :  { %425 = vmatprep.subr.bf16.mxu1 %v492_v2  ;;  %v426_v11 = vpack.c.bf16 %v126_v10, %v125_v9  ;;  %v429_v14 = vpack.c.bf16 %v210_v13, %v209_v12  ;;  %v370_v15 = vld [vmem:[%s648_s3] ss:$0 sm:$0xff]  ;;  %v211_v20 = vld [vmem:[%s651_s6 + $0x10] sm:$0xff]  ;;  %v212_v21 = vld [vmem:[%s651_s6 + $0x18] sm:$0xff]  ;;  %v296_v34 = vand.u32 127, %v295_v33  ;;  %443 = vset.pattern.permute.xlu0 %v496_v50  ;;  %s497_s2 = smov [#allocation3]  }
   0x7   :  { %395 = vmatmul.mubr.msk.f32.vlgmr.msra.gmra.mrb[0].mxu0 %vm48_vm1, %v38_v8  ;;  %v432_v22 = vpack.c.bf16 %v212_v21, %v211_v20  ;;  %v372_v23 = vld [vmem:[%s650_s5] ss:$0 sm:$0xff]  ;;  %s344_s25 = sshll.u32 %s497_s2, 4  ;;  %s345_s25 = int_to_ptr.vmem [resolvable:$true] %s344_s25 }
   0x8   :  { %416 = vmatprep.mubr.msk.f32.mxu0 %vm493_vm0, %v494_v4  ;;  %430 = vmatpush3.bf16.msra.mxu0 %v429_v14  ;;  %v374_v28 = vld [vmem:[%s652_s7] ss:$0 sm:$0xff]  ;;  %s495_s7 = smov 127   ;;  %s444_s26 = scalar_lea.vmem %s345_s25, 128 }
   0x9   :  { %427 = vmatpush3.bf16.msra.mxu1 %v426_v11  ;;  %431 = vmatprep.subr.bf16.mxu0 %v492_v2  ;;  %v317_v40 = vld [vmem:[%s653_s8] sm:$0xff]  ;;  %p445_p0 = scmp.ne.s32.totalorder %s345_s25, %s444_s26  ;;  %p449_p1 = scmp.lt.s32.totalorder %s345_s25, %s345_s25 }
   0xa   :  { %v318_v42 = vmul.f32 8.0, %v317_v40  ;;  %vm325_vm7 = vcmp.lt.f32.partialorder %v317_v40, %v324_v52  ;;  %p450_p2 = scmp.lt.s32.totalorder %s444_s26, %s444_s26 }
   0xc   :  { %433 = vmatpush3.bf16.msra.mxu0 %v432_v22  ;;  %v319_v46 = vfloor.f32 %v318_v42  ;;  %p451_p3 = por %p450_p2, %p449_p1 }
   0xe   :  { %v434_v47 = vtrunc.f32 %v319_v46  ;;  %p452_p4 = pnand %p451_p3, %p445_p0 }
  0x10   :  { %v435_v48 = vcvt.f32.s32 %v434_v47 }
  0x12   :  { %vm321_vm6 = vcmp.lt.s32.totalorder %v435_v48, 7 }
  0x13   :  { %v322_v49 = vsel %vm321_vm6, %v435_v48, 7 }
  0xda   :  { %v118_v16 = vpop.f32.mrb[0].mxu0 }
  0xdb   :  { %v119_v17 = vadd.f32 %v370_v15, %v118_v16  ;;  %v396_v18 = vpop.f32.mrb[1].mxu0 }
  0xdd   :  { %v122_v19 = vmax.f32 %v119_v17, 0.0 }
  0xdf   :  { %406 = vmatmul.mubr.msk.f32.vlgmr.msra.gmra.mrb[0].mxu1 %vm134_vm2, %v122_v19 }
 0x1b2   :  { %v204_v24 = vpop.f32.mrb[0].mxu1 }
 0x1b3   :  { %v205_v25 = vadd.f32 %v372_v23, %v204_v24  ;;  %v407_v26 = vpop.f32.mrb[1].mxu1 }
 0x1b5   :  { %v208_v27 = vmax.f32 %v205_v25, 0.0 }
 0x1b7   :  { %417 = vmatmul.mubr.msk.f32.vlgmr.msra.gmra.mrb[2].mxu0 %vm134_vm2, %v208_v27 }
 0x28a   :  { %v289_v29 = vpop.f32.mrb[2].mxu0 }
 0x28b   :  { %v290_v30 = vadd.f32 %v374_v28, %v289_v29  ;;  %v418_v31 = vpop.f32.mrb[3].mxu0 }
 0x28d   :  { %v297_v32 = vsel %vm293_vm3, %v290_v30, -inf  ;;  %294 = vst.msk [vmem:[#allocation3] sm:$0xff] %vm293_vm3, %v290_v30 }
 0x28e   :  { %298 = vmax.xlane.f32.xlu0 %v297_v32 }
 0x31b   :  { %v299_v35 = vpop.xlane.xlu0 %298 }
 0x31c   :  { %vm300_vm4 = vcmp.eq.f32.partialorder %v290_v30, %v299_v35 }
 0x31d   :  { %v301_v36 = vsel %vm300_vm4, %v296_v34, 8 }
 0x31e   :  { %v302_v37 = vsel %vm293_vm3, %v301_v36, 2147483647 }
 0x31f   :  { %v304_v38 = vshra.s32 %v302_v37, 16  ;;  %v303_v41 = vand.u32 65535, %v302_v37 }
 0x321   :  { %v306_v39 = vcvt.s32.f32 %v304_v38  ;;  %v305_v44 = vcvt.s32.f32 %v303_v41 }
 0x323   :  { %307 = vmin.xlane.f32.xlu0 %v306_v39 }
 0x3b0   :  { %v308_v43 = vpop.xlane.xlu0 %307 }
 0x3b1   :  { %vm309_vm5 = vcmp.eq.f32.partialorder %v306_v39, %v308_v43  ;;  %v314_v51 = vcvt.f32.s32 %v308_v43 }
 0x3b2   :  { %v310_v45 = vsel %vm309_vm5, %v305_v44, inf }
 0x3b3   :  { %311 = vmin.xlane.f32.xlu1 %v310_v45  ;;  %v315_v54 = vshll.u32 %v314_v51, 16 }
 0x3c4   :  { %326 = vrot.lane.b32.xlu1 %v322_v49, %s495_s7 }
 0x440   :  { %v312_v53 = vpop.xlane.xlu1 %311 }
 0x441   :  { %v313_v55 = vcvt.f32.s32 %v312_v53 }
 0x443   :  { %v316_v56 = vadd.s32 %v315_v54, %v313_v55 }
 0x444   :  { %v327_v57 = vpop.permute.xlu1 %326 }
 0x445   :  { %v328_v58 = vsel %vm325_vm7, %v327_v57, %v316_v56 }
 0x446   :  { %332 = vperm.xlu0 %443, %v328_v58   ;;  %330 = vst.msk [vmem:[%s655_s10] sm:$0xff] %vm329_vm8, %v328_v58 }
 0x447   :  { %455 = shalt.err (!%p452_p4)
}
 0x448   :  { %s456_s28 = scalar_lea.hbm %s654_s9, 128 }
 0x449   :  { %p457_p5 = scmp.ne.s32.totalorder %s654_s9, %s456_s28  ;;  %p460_p6 = scmp.lt.u32.totalorder %s456_s28, %s654_s9 }
 0x44b   :  { %p462_p7 = pnand %p460_p6, %p457_p5 }
 0x44d   :  { %465 = shalt.err (!%p462_p7)
}
 0x44e   :  { %347 = dma.vmem_to_hbm [thread:$0]  %s345_s25, 128, %s654_s9, [#allocation4]  }
 0x44f   :  { %s498_s14 = smov [#allocation5]  }
 0x450   :  { %s356_s15 = sshll.u32 %s498_s14, 4  ;;  %s357_s15 = int_to_ptr.vmem [resolvable:$true] %s356_s15 }
 0x451   :  { %s466_s4 = scalar_lea.vmem %s357_s15, 128  ;;  %p471_p9 = scmp.lt.s32.totalorder %s357_s15, %s357_s15 }
 0x452   :  { %p467_p8 = scmp.ne.s32.totalorder %s357_s15, %s466_s4  ;;  %p472_p10 = scmp.lt.s32.totalorder %s466_s4, %s466_s4 }
 0x454   :  { %p473_p11 = por %p472_p10, %p471_p9 }
 0x456   :  { %p474_p12 = pnand %p473_p11, %p467_p8 }
 0x4c5   :  { %v333_v59 = vpop.permute.xlu0 %332 }
 0x4c6   :  { %vm334_vm9 = vcmp.eq.s32.totalorder %v296_v34, %v333_v59 }
 0x4c7   :  { %v376_v60 = vsel %vm334_vm9, 1.0, %v494_v4 }
 0x4c8   :  { %337 = vst.msk [vmem:[#allocation5] sm:$0xff] %vm293_vm3, %v376_v60 }
 0x4c9   :  { %477 = shalt.err (!%p474_p12)
}
 0x4ca   :  { %s478_s9 = scalar_lea.hbm %s656_s11, 128 }
 0x4cb   :  { %p479_p13 = scmp.ne.s32.totalorder %s656_s11, %s478_s9  ;;  %p482_p0 = scmp.lt.u32.totalorder %s478_s9, %s656_s11 }
 0x4cd   :  { %p484_p1 = pnand %p482_p0, %p479_p13 }
 0x4cf   :  { %487 = shalt.err (!%p484_p1)
}
 0x4d0   :  { %359 = dma.vmem_to_hbm [thread:$0]  %s357_s15, 128, %s656_s11, [#allocation6]  }
 0x4d1   :  { %488 = dma.done.wait [#allocation4], 128  }
 0x4d2   :  { %489 = vsyncadd [#allocation4], 4294967168 }
 0x4d3   :  { %490 = dma.done.wait [#allocation6], 128  }
 0x4d4   :  { %491 = vsyncadd [#allocation6], 4294967168 }
 0x4d5   :  { %368 = vsyncpa [#allocation4], 1 }
 0x4d6   :  { %369 = vsyncpa [#allocation6], 1 }

</bundles_post_ra>
